<compile_context>
chip_gen: v7x
topology: tpu7x:2x2x1
jax: 0.10.0
libtpu: 0.0.40
codegen_flags: <defaults>
</compile_context>

<pallas_src>
import functools

import jax
import jax.numpy as jnp
from jax import lax
from jax.experimental import pallas as pl
from jax.experimental.pallas import tpu as pltpu


_CHUNK = 1024   # rows per inner-loop step; keeps lane-padded intermediates small


def _round_up(n, m):
    return ((n + m - 1) // m) * m


def _cdiv(a, b):
    return (a + b - 1) // b


def _ae_kernel(x_ref,
               w1_ref, b1_ref,
               w2_ref, b2_ref,
               w3_ref, b3_ref,
               w4_ref, b4_ref,
               o_ref):
    """Fused autoencoder forward on one (TILE_B, D) batch tile (natural layout).

    encoder: Linear(D,8) -> ReLU -> Linear(8,4) -> ReLU
    decoder: Linear(4,8) -> ReLU -> Linear(8,D)

    Weights arrive pre-transposed: wK_ref is (in_features, out_features),
    bK_ref is (1, out_features), so each layer is h = relu(h @ W + b) with
    everything kept in (rows=batch, cols=features) layout.  The tile is
    processed in _CHUNK-row slices so intermediates do not scale with TILE_B.
    """
    tile = x_ref.shape[0]              # static
    chunk = min(_CHUNK, tile)
    nchunks = tile // chunk            # wrapper guarantees tile % chunk == 0

    # TODO(synk): if a bundle dump on v6e/v7x shows the vex/vst issue slots
    # binding once HBM is saturated, cast activations to bf16 for the matmuls
    # (keep preferred_element_type=f32).  Kept f32 here for exact parity.
    def body(c, carry):
        r = pl.multiple_of(c * chunk, chunk)
        h = x_ref[pl.ds(r, chunk), :]                                   # (chunk, D)
        h = jnp.dot(h, w1_ref[...], preferred_element_type=jnp.float32) + b1_ref[...]
        h = jnp.maximum(h, 0.0)                                         # (chunk, 8)
        h = jnp.dot(h, w2_ref[...], preferred_element_type=jnp.float32) + b2_ref[...]
        h = jnp.maximum(h, 0.0)                                         # (chunk, 4)
        h = jnp.dot(h, w3_ref[...], preferred_element_type=jnp.float32) + b3_ref[...]
        h = jnp.maximum(h, 0.0)                                         # (chunk, 8)
        out = jnp.dot(h, w4_ref[...], preferred_element_type=jnp.float32) + b4_ref[...]
        o_ref[pl.ds(r, chunk), :] = out.astype(o_ref.dtype)             # (chunk, D)
        return carry

    lax.fori_loop(0, nchunks, body, 0)


@functools.partial(jax.jit, static_argnames=("tile_b",))
def anomaly_detector_forward(x, params, *, tile_b=16384):
    """x: (B, input_dim) float32.  params: PyTorch-layout weights/biases.

    params["wK"]: (out_features, in_features); params["bK"]: (out_features,).
    Returns (B, input_dim) float32, matching decoder(encoder(x)).
    """
    B, D = x.shape

    # Sublane alignment only (no rounding up to a full tile).
    b_pad = _round_up(B, 8)
    if b_pad != B:
        x = jnp.pad(x, ((0, b_pad - B), (0, 0)))

    lane_pad = _round_up(D, 128)

    # ---- Tile selection under an explicit VMEM budget -----------------------
    # Each in/out block buffer costs tile * lane_pad * 4 bytes in VMEM (the
    # feature axis is lane-padded to 128); both are double-buffered by the
    # pipeline.  Budget ~40 MiB for those four buffers so the kernel also fits
    # v7x's 64 MiB physical VMEM with headroom for intermediates + scratch.
    io_budget = 40 << 20
    max_tile = max((io_budget // (4 * lane_pad * 4)) // _CHUNK * _CHUNK, _CHUNK)

    if b_pad <= _CHUNK:
        tile = b_pad                              # single small block
    else:
        tile = min(_round_up(tile_b, _CHUNK), _round_up(b_pad, _CHUNK), max_tile)
        # Keep >= 2 grid steps when there is enough work, so v7x's two
        # TensorCores both get batch tiles (harmless on single-TC v5e/v6e).
        half = _round_up(_cdiv(b_pad, 2), _CHUNK)
        if half >= 4 * _CHUNK:
            tile = min(tile, half)

    grid = (_cdiv(b_pad, tile),)

    # Raise the scoped VMEM limit to cover the double-buffered in/out blocks
    # plus an allowance for intermediates/scratch.  Needed because scoped
    # defaults are 16 MiB (v5e) / 32 MiB (v6e, v7x); the result stays <= ~56 MiB,
    # under v7x's 64 MiB physical VMEM.
    vmem_limit = int(4 * tile * lane_pad * 4 + (16 << 20))

    # Tiny one-time layout prep: transposed weights (in, out), (1, out) biases.
    w1t, w2t = params["w1"].T, params["w2"].T
    w3t, w4t = params["w3"].T, params["w4"].T
    b1 = params["b1"].reshape(1, -1)
    b2 = params["b2"].reshape(1, -1)
    b3 = params["b3"].reshape(1, -1)
    b4 = params["b4"].reshape(1, -1)
    weight_args = (w1t, b1, w2t, b2, w3t, b3, w4t, b4)

    x_spec = pl.BlockSpec((tile, D), lambda i: (i, 0))
    # Full-array blocks + constant index_map => DMA'd once, VMEM-resident.
    weight_specs = [pl.BlockSpec(w.shape, lambda i: (0, 0)) for w in weight_args]
    out_spec = pl.BlockSpec((tile, D), lambda i: (i, 0))

    out = pl.pallas_call(
        _ae_kernel,
        out_shape=jax.ShapeDtypeStruct((b_pad, D), jnp.float32),
        grid=grid,
        in_specs=[x_spec] + weight_specs,
        out_specs=out_spec,
        compiler_params=pltpu.CompilerParams(
            dimension_semantics=("parallel",),
            vmem_limit_bytes=vmem_limit),
    )(x, *weight_args)

    if b_pad != B:
        out = out[:B]
    return out


def init_params(input_dim=10, seed=0):
    """Deterministic init mimicking PyTorch Linear default U[-1/sqrt(fan_in), +].

    Weights are stored PyTorch-style (out_features, in_features); biases are
    (out_features,)."""
    key = jax.random.PRNGKey(seed)
    dims = [(input_dim, 8), (8, 4), (4, 8), (8, input_dim)]   # (fan_in, fan_out)
    params = {}
    for i, (fin, fout) in enumerate(dims, start=1):
        key, kw, kb = jax.random.split(key, 3)
        bound = 1.0 / jnp.sqrt(float(fin))
        params[f"w{i}"] = jax.random.uniform(
            kw, (fout, fin), jnp.float32, minval=-bound, maxval=bound)
        params[f"b{i}"] = jax.random.uniform(
            kb, (fout,), jnp.float32, minval=-bound, maxval=bound)
    return params


def _reference_forward(x, params):
    """Pure-JAX reference (PyTorch semantics: x @ W.T + b)."""
    h = jnp.maximum(x @ params["w1"].T + params["b1"], 0.0)
    h = jnp.maximum(h @ params["w2"].T + params["b2"], 0.0)
    h = jnp.maximum(h @ params["w3"].T + params["b3"], 0.0)
    return h @ params["w4"].T + params["b4"]


if __name__ == "__main__":
    input_dim = 10
    batch = 8

    key = jax.random.PRNGKey(0)
    x = jax.random.normal(key, (batch, input_dim), dtype=jnp.float32)

    params = init_params(input_dim=input_dim, seed=0)

    out = anomaly_detector_forward(x, params)
    out = jax.block_until_ready(out)

    ref = _reference_forward(x, params)
    assert out.shape == (batch, input_dim)
    assert jnp.allclose(out, ref, atol=1e-4, rtol=1e-4), (
        float(jnp.max(jnp.abs(out - ref))))

    print("KERNEL_OK")
</pallas_src>

<mosaic_0001>
module attributes {stable_mosaic.version = 11 : i64} {
  func.func @_ae_kernel(%arg0: i32, %arg1: memref<8x10xf32, #tpu.memory_space<vmem>>, %arg2: memref<10x8xf32, #tpu.memory_space<vmem>>, %arg3: memref<1x8xf32, #tpu.memory_space<vmem>>, %arg4: memref<8x4xf32, #tpu.memory_space<vmem>>, %arg5: memref<1x4xf32, #tpu.memory_space<vmem>>, %arg6: memref<4x8xf32, #tpu.memory_space<vmem>>, %arg7: memref<1x8xf32, #tpu.memory_space<vmem>>, %arg8: memref<8x10xf32, #tpu.memory_space<vmem>>, %arg9: memref<1x10xf32, #tpu.memory_space<vmem>>, %arg10: memref<8x10xf32, #tpu.memory_space<vmem>>) attributes {dimension_semantics = [#tpu.dimension_semantics<parallel>], iteration_bounds = array<i64: 1>, scalar_prefetch = 0 : i64, scratch_operands = 0 : i64, tpu.core_type = #tpu.core_type<tc>, window_params = [{transform_indices = @transform_0, window_bounds = array<i64: 8, 10>}, {pipeline_mode = #tpu.pipeline_mode<synchronous>, transform_indices = @transform_1, window_bounds = array<i64: 10, 8>}, {pipeline_mode = #tpu.pipeline_mode<synchronous>, transform_indices = @transform_2, window_bounds = array<i64: 1, 8>}, {pipeline_mode = #tpu.pipeline_mode<synchronous>, transform_indices = @transform_3, window_bounds = array<i64: 8, 4>}, {pipeline_mode = #tpu.pipeline_mode<synchronous>, transform_indices = @transform_4, window_bounds = array<i64: 1, 4>}, {pipeline_mode = #tpu.pipeline_mode<synchronous>, transform_indices = @transform_5, window_bounds = array<i64: 4, 8>}, {pipeline_mode = #tpu.pipeline_mode<synchronous>, transform_indices = @transform_6, window_bounds = array<i64: 1, 8>}, {pipeline_mode = #tpu.pipeline_mode<synchronous>, transform_indices = @transform_7, window_bounds = array<i64: 8, 10>}, {pipeline_mode = #tpu.pipeline_mode<synchronous>, transform_indices = @transform_8, window_bounds = array<i64: 1, 10>}, {transform_indices = @transform_9, window_bounds = array<i64: 8, 10>}]} {
    %c0_i32 = arith.constant 0 : i32
    %c8_i32 = arith.constant 8 : i32
    %0 = arith.muli %c0_i32, %c8_i32 : i32
    %1 = tpu.assume_multiple %0, 8 : i32
    %2 = arith.index_cast %1 : i32 to index
    %c0 = arith.constant 0 : index
    %3 = vector.load %arg1[%2, %c0] : memref<8x10xf32, #tpu.memory_space<vmem>>, vector<8x10xf32>
    %c0_0 = arith.constant 0 : index
    %c0_1 = arith.constant 0 : index
    %4 = vector.load %arg2[%c0_0, %c0_1] : memref<10x8xf32, #tpu.memory_space<vmem>>, vector<10x8xf32>
    %cst = arith.constant dense<0.000000e+00> : vector<8x8xf32>
    %5 = tpu.matmul %3, %4, %cst {dimension_numbers = #tpu.dot_dimension_numbers<[1], [0], [0], [1], [0, 0, 1, 1], [], []>} : vector<8x10xf32>, vector<10x8xf32>, vector<8x8xf32> -> vector<8x8xf32>
    %c0_2 = arith.constant 0 : index
    %c0_3 = arith.constant 0 : index
    %6 = vector.load %arg3[%c0_2, %c0_3] : memref<1x8xf32, #tpu.memory_space<vmem>>, vector<1x8xf32>
    %7 = vector.broadcast %6 : vector<1x8xf32> to vector<8x8xf32>
    %8 = arith.addf %5, %7 : vector<8x8xf32>
    %cst_4 = arith.constant 0.000000e+00 : f32
    %9 = vector.broadcast %cst_4 : f32 to vector<8x8xf32>
    %10 = arith.maximumf %8, %9 : vector<8x8xf32>
    %c0_5 = arith.constant 0 : index
    %c0_6 = arith.constant 0 : index
    %11 = vector.load %arg4[%c0_5, %c0_6] : memref<8x4xf32, #tpu.memory_space<vmem>>, vector<8x4xf32>
    %cst_7 = arith.constant dense<0.000000e+00> : vector<8x4xf32>
    %12 = tpu.matmul %10, %11, %cst_7 {dimension_numbers = #tpu.dot_dimension_numbers<[1], [0], [0], [1], [0, 0, 1, 1], [], []>} : vector<8x8xf32>, vector<8x4xf32>, vector<8x4xf32> -> vector<8x4xf32>
    %c0_8 = arith.constant 0 : index
    %c0_9 = arith.constant 0 : index
    %13 = vector.load %arg5[%c0_8, %c0_9] : memref<1x4xf32, #tpu.memory_space<vmem>>, vector<1x4xf32>
    %14 = vector.broadcast %13 : vector<1x4xf32> to vector<8x4xf32>
    %15 = arith.addf %12, %14 : vector<8x4xf32>
    %cst_10 = arith.constant 0.000000e+00 : f32
    %16 = vector.broadcast %cst_10 : f32 to vector<8x4xf32>
    %17 = arith.maximumf %15, %16 : vector<8x4xf32>
    %c0_11 = arith.constant 0 : index
    %c0_12 = arith.constant 0 : index
    %18 = vector.load %arg6[%c0_11, %c0_12] : memref<4x8xf32, #tpu.memory_space<vmem>>, vector<4x8xf32>
    %cst_13 = arith.constant dense<0.000000e+00> : vector<8x8xf32>
    %19 = tpu.matmul %17, %18, %cst_13 {dimension_numbers = #tpu.dot_dimension_numbers<[1], [0], [0], [1], [0, 0, 1, 1], [], []>} : vector<8x4xf32>, vector<4x8xf32>, vector<8x8xf32> -> vector<8x8xf32>
    %c0_14 = arith.constant 0 : index
    %c0_15 = arith.constant 0 : index
    %20 = vector.load %arg7[%c0_14, %c0_15] : memref<1x8xf32, #tpu.memory_space<vmem>>, vector<1x8xf32>
    %21 = vector.broadcast %20 : vector<1x8xf32> to vector<8x8xf32>
    %22 = arith.addf %19, %21 : vector<8x8xf32>
    %cst_16 = arith.constant 0.000000e+00 : f32
    %23 = vector.broadcast %cst_16 : f32 to vector<8x8xf32>
    %24 = arith.maximumf %22, %23 : vector<8x8xf32>
    %c0_17 = arith.constant 0 : index
    %c0_18 = arith.constant 0 : index
    %25 = vector.load %arg8[%c0_17, %c0_18] : memref<8x10xf32, #tpu.memory_space<vmem>>, vector<8x10xf32>
    %cst_19 = arith.constant dense<0.000000e+00> : vector<8x10xf32>
    %26 = tpu.matmul %24, %25, %cst_19 {dimension_numbers = #tpu.dot_dimension_numbers<[1], [0], [0], [1], [0, 0, 1, 1], [], []>} : vector<8x8xf32>, vector<8x10xf32>, vector<8x10xf32> -> vector<8x10xf32>
    %c0_20 = arith.constant 0 : index
    %c0_21 = arith.constant 0 : index
    %27 = vector.load %arg9[%c0_20, %c0_21] : memref<1x10xf32, #tpu.memory_space<vmem>>, vector<1x10xf32>
    %28 = vector.broadcast %27 : vector<1x10xf32> to vector<8x10xf32>
    %29 = arith.addf %26, %28 : vector<8x10xf32>
    %30 = arith.index_cast %1 : i32 to index
    %c0_22 = arith.constant 0 : index
    %31 = vector.load %arg10[%30, %c0_22] : memref<8x10xf32, #tpu.memory_space<vmem>>, vector<8x10xf32>
    tpu.vector_store %arg10[%30, %c0_22], %29 {strides = array<i32>} : memref<8x10xf32, #tpu.memory_space<vmem>>, vector<8x10xf32>,
    %c1_i32 = arith.constant 1 : i32
    return
  }
  func.func @transform_0(%arg0: i32) -> (i32, i32) {
    %c0_i32 = arith.constant 0 : i32
    %c0_i32_0 = arith.constant 0 : i32
    return %arg0, %c0_i32 : i32, i32
  }
  func.func @transform_1(%arg0: i32) -> (i32, i32) {
    %c0_i32 = arith.constant 0 : i32
    %c0_i32_0 = arith.constant 0 : i32
    %c0_i32_1 = arith.constant 0 : i32
    return %c0_i32, %c0_i32_0 : i32, i32
  }
  func.func @transform_2(%arg0: i32) -> (i32, i32) {
    %c0_i32 = arith.constant 0 : i32
    %c0_i32_0 = arith.constant 0 : i32
    %c0_i32_1 = arith.constant 0 : i32
    return %c0_i32, %c0_i32_0 : i32, i32
  }
  func.func @transform_3(%arg0: i32) -> (i32, i32) {
    %c0_i32 = arith.constant 0 : i32
    %c0_i32_0 = arith.constant 0 : i32
    %c0_i32_1 = arith.constant 0 : i32
    return %c0_i32, %c0_i32_0 : i32, i32
  }
  func.func @transform_4(%arg0: i32) -> (i32, i32) {
    %c0_i32 = arith.constant 0 : i32
    %c0_i32_0 = arith.constant 0 : i32
    %c0_i32_1 = arith.constant 0 : i32
    return %c0_i32, %c0_i32_0 : i32, i32
  }
  func.func @transform_5(%arg0: i32) -> (i32, i32) {
    %c0_i32 = arith.constant 0 : i32
    %c0_i32_0 = arith.constant 0 : i32
    %c0_i32_1 = arith.constant 0 : i32
    return %c0_i32, %c0_i32_0 : i32, i32
  }
  func.func @transform_6(%arg0: i32) -> (i32, i32) {
    %c0_i32 = arith.constant 0 : i32
    %c0_i32_0 = arith.constant 0 : i32
    %c0_i32_1 = arith.constant 0 : i32
    return %c0_i32, %c0_i32_0 : i32, i32
  }
  func.func @transform_7(%arg0: i32) -> (i32, i32) {
    %c0_i32 = arith.constant 0 : i32
    %c0_i32_0 = arith.constant 0 : i32
    %c0_i32_1 = arith.constant 0 : i32
    return %c0_i32, %c0_i32_0 : i32, i32
  }
  func.func @transform_8(%arg0: i32) -> (i32, i32) {
    %c0_i32 = arith.constant 0 : i32
    %c0_i32_0 = arith.constant 0 : i32
    %c0_i32_1 = arith.constant 0 : i32
    return %c0_i32, %c0_i32_0 : i32, i32
  }
  func.func @transform_9(%arg0: i32) -> (i32, i32) {
    %c0_i32 = arith.constant 0 : i32
    %c0_i32_0 = arith.constant 0 : i32
    return %arg0, %c0_i32 : i32, i32
  }
}

</mosaic_0001>

<bundles_post_ra>
// kernel: anomaly_detector_forward.1
= control target key start
LH: loop header
LB: loop body
LE: loop exit
PB: predicated region body
PF: predicated region fallthrough
CT: control target
= control target key end

     0   :  { %vm47_vm0 = vcmask 1041408   ;;  %v462_v2 = vmov 0.0|0.0   ;;  %vm463_vm1 = vmmov 1   ;;  %vm464_vm3 = vmmov 0   ;;  %s567_s0 = inlined_call_operand.vmem [shape: f32[8,10], index: 0, kind: input, shape index: {}]   ;;  %s568_s1 = inlined_call_operand.vmem [shape: f32[10,8], index: 1, kind: input, shape index: {}]   ;;  %s569_s2 = inlined_call_operand.vmem [shape: f32[1,8], index: 2, kind: input, shape index: {}]   ;;  %s570_s3 = inlined_call_operand.vmem [shape: f32[8,4], index: 3, kind: input, shape index: {}]   ;;  %s571_s4 = inlined_call_operand.vmem [shape: f32[1,4], index: 4, kind: input, shape index: {}]   ;;  %s572_s5 = inlined_call_operand.vmem [shape: f32[4,8], index: 5, kind: input, shape index: {}]   ;;  %s573_s6 = inlined_call_operand.vmem [shape: f32[1,8], index: 6, kind: input, shape index: {}]   ;;  %s574_s7 = inlined_call_operand.vmem [shape: f32[8,10], index: 7, kind: input, shape index: {}]   ;;  %s575_s8 = inlined_call_operand.vmem [shape: f32[1,10], index: 8, kind: input, shape index: {}]   ;;  %s576_s9 = inlined_call_operand.hbm [shape: f32[8,10], index: 9, kind: output, shape index: {}]  }
   0x1   :  { %v34_v0 = vld [vmem:[%s568_s1] sm:$0xff]  ;;  %v35_v1 = vld [vmem:[%s568_s1 + $0x8] sm:$0x3]  ;;  %429 = vmatprep.subr.bf16.mxu0 %v462_v2  ;;  %vm431_vm2 = vmpackc.low %vm47_vm0, %vm463_vm1  ;;  %v465_v4 = vmov 0.0  }
   0x2   :  { %v430_v3 = vpack.c.bf16 %v35_v1, %v34_v0  ;;  %411 = vmatprep.mubr.msk.f32.mxu0 %vm464_vm3, %v465_v4  ;;  %414 = vmatprep.subr.mxu1 %v465_v4 }
   0x3   :  { %14 = vsyncpa [#allocation3], 0  ;;  %v33_v5 = vld [vmem:[%s567_s0] sm:$0xff]  ;;  %vm43_vm4 = vcmask 80896   ;;  %416 = vmatprep.mubr.msk.f32.mxu1 %vm464_vm3, %v465_v4  ;;  %vm130_vm5 = vcmask 64512   ;;  %vm217_vm6 = vcmask 1043456  }
   0x4   :  { %432 = vmatpush3.bf16.msk.msra.mxu0 %vm431_vm2, %v430_v3  ;;  %v122_v6 = vld [vmem:[%s570_s3] sm:$0xff]  ;;  %vm213_vm7 = vcmask 31744   ;;  %s466_s23 = smov [#allocation2]  }
   0x5   :  { %424 = vmatprep.subr.mxu0 %v465_v4  ;;  %415 = vmatpush3.msra.mxu1 %v122_v6  ;;  %v388_v7 = vld [vmem:[%s569_s2] ss:$0 sm:$0xff]  ;;  %s380_s24 = sshll.u32 %s466_s23, 4  ;;  %s381_s24 = int_to_ptr.vmem [resolvable:$true] %s380_s24 }
   0x6   :  { %419 = vmatprep.subr.mxu1 %v465_v4  ;;  %v205_v12 = vld [vmem:[%s572_s5] sm:$0xf]  ;;  %p443_p1 = scmp.lt.s32.totalorder %s381_s24, %s381_s24 }
   0x7   :  { %412 = vmatmul.mubr.msk.f32.vlgmr.msra.gmra.mrb[0].mxu0 %vm43_vm4, %v33_v5  ;;  %v391_v13 = vld [vmem:[%s571_s4] ss:$0 sm:$0xff] }
   0x8   :  { %426 = vmatprep.mubr.msk.f32.mxu0 %vm464_vm3, %v465_v4  ;;  %v292_v18 = vld [vmem:[%s574_s7] sm:$0xff]  ;;  %s438_s7 = scalar_lea.vmem %s381_s24, 128 }
   0x9   :  { %425 = vmatpush3.msra.mxu0 %v292_v18  ;;  %v393_v19 = vld [vmem:[%s573_s6] ss:$0 sm:$0xff]  ;;  %p439_p0 = scmp.ne.s32.totalorder %s381_s24, %s438_s7  ;;  %p444_p2 = scmp.lt.s32.totalorder %s438_s7, %s438_s7 }
   0xa   :  { %v396_v24 = vld [vmem:[%s575_s8] ss:$0 sm:$0xff] }
   0xb   :  { %p445_p3 = por %p444_p2, %p443_p1 }
   0xd   :  { %p446_p4 = pnand %p445_p3, %p439_p0 }
  0xda   :  { %v117_v8 = vpop.f32.mrb[0].mxu0 }
  0xdb   :  { %v118_v9 = vadd.f32 %v388_v7, %v117_v8  ;;  %v413_v10 = vpop.f32.mrb[1].mxu0 }
  0xdd   :  { %v121_v11 = vmax.f32 %v118_v9, 0.0 }
  0xdf   :  { %417 = vmatmul.mubr.msk.f32.vlgmr.msra.gmra.mrb[0].mxu1 %vm130_vm5, %v121_v11 }
  0xe0   :  { %421 = vmatprep.mubr.msk.f32.mxu1 %vm464_vm3, %v465_v4  ;;  %420 = vmatpush3.msk.msra.mxu1 %vm217_vm6, %v205_v12 }
 0x1b2   :  { %v200_v14 = vpop.f32.mrb[0].mxu1 }
 0x1b3   :  { %v201_v15 = vadd.f32 %v391_v13, %v200_v14  ;;  %v418_v16 = vpop.f32.mrb[1].mxu1 }
 0x1b5   :  { %v204_v17 = vmax.f32 %v201_v15, 0.0 }
 0x1b7   :  { %422 = vmatmul.mubr.msk.f32.vlgmr.msra.gmra.mrb[2].mxu1 %vm213_vm7, %v204_v17 }
 0x28a   :  { %v287_v20 = vpop.f32.mrb[2].mxu1 }
 0x28b   :  { %v288_v21 = vadd.f32 %v393_v19, %v287_v20  ;;  %v423_v22 = vpop.f32.mrb[3].mxu1 }
 0x28d   :  { %v291_v23 = vmax.f32 %v288_v21, 0.0 }
 0x28f   :  { %427 = vmatmul.mubr.msk.f32.vlgmr.msra.gmra.mrb[2].mxu0 %vm130_vm5, %v291_v23 }
 0x362   :  { %v369_v25 = vpop.f32.mrb[2].mxu0 }
 0x363   :  { %v370_v26 = vadd.f32 %v396_v24, %v369_v25  ;;  %v428_v27 = vpop.f32.mrb[3].mxu0 }
 0x365   :  { %373 = vst.msk [vmem:[#allocation2] sm:$0xff] %vm43_vm4, %v370_v26 }
 0x366   :  { %449 = shalt.err (!%p446_p4)
}
 0x367   :  { %s450_s26 = scalar_lea.hbm %s576_s9, 128 }
 0x368   :  { %p451_p5 = scmp.ne.s32.totalorder %s576_s9, %s450_s26  ;;  %p454_p6 = scmp.lt.u32.totalorder %s450_s26, %s576_s9 }
 0x36a   :  { %p456_p7 = pnand %p454_p6, %p451_p5 }
 0x36c   :  { %459 = shalt.err (!%p456_p7)
}
 0x36d   :  { %383 = dma.vmem_to_hbm [thread:$0]  %s381_s24, 128, %s576_s9, [#allocation3]  }
 0x36e   :  { %460 = dma.done.wait [#allocation3], 128  }
 0x36f   :  { %461 = vsyncadd [#allocation3], 4294967168 }
 0x370   :  { %387 = vsyncpa [#allocation3], 1 }

</bundles_post_ra>
